<compile_context>
chip_gen: v6e
topology: v6e:2x2x1
jax: 0.10.0
libtpu: 0.0.40
codegen_flags: <defaults>
</compile_context>

<pallas_src>
import functools
import math

import jax
import jax.numpy as jnp
from jax.experimental import pallas as pl
from jax.experimental.pallas import tpu as pltpu

BN_EPS = 1e-5
QCOEFS = (-2.02, -0.765, -0.195, 0.315, 0.93)
NQ = len(QCOEFS)
LANES = 128
DEFAULT_MAX_BLOCK_BYTES = 4 * 1024 * 1024   # (B,tH) f32 block cap, safe on v7x
DEFAULT_FUSE_LIMIT_BYTES = 4 * 1024 * 1024  # whole (B,H128) f32 -> fused path
MIN_VMEM_LIMIT = 32 * 1024 * 1024
MAX_VMEM_LIMIT = 128 * 1024 * 1024


def _round_up(a: int, b: int) -> int:
    return (a + b - 1) // b * b


def _pick_tile(batch: int, h_pad: int, max_block_bytes: int) -> int:
    """Largest 128-multiple divisor of h_pad whose (batch, tH) f32 block fits."""
    k = h_pad // LANES
    best = LANES
    for d in range(1, k + 1):
        if k % d:
            continue
        th = d * LANES
        if batch * th * 4 <= max_block_bytes:
            best = th
    return best


# --------------------------------------------------------------------------
# Fused single-call kernel (whole padded array resident in VMEM).
# grid = (NQ,); x block index is constant -> read from HBM once.
# --------------------------------------------------------------------------
def _fused_kernel(x_ref, o_ref, xn_ref, q_ref, *, apply_bn, batch, hidden):
    i = pl.program_id(0)

    @pl.when(i == 0)
    def _prep():
        x = x_ref[...].astype(jnp.float32)                   # (B, H_pad)
        n = batch * hidden            # NOTE: n == 1 -> inf/nan (same as torch.var)
        if apply_bn:
            mean_f = jnp.mean(x, axis=0, keepdims=True)      # (1, H_pad)
            c = x - mean_f
            var_f = jnp.mean(c * c, axis=0, keepdims=True)
            xn_ref[...] = c * jax.lax.rsqrt(var_f + BN_EPS)
            # post affine-free BN: global mean is exactly 0 and
            # sum(x_norm^2) == B * sum_j var_j/(var_j+eps); padded columns
            # have var==0 and contribute exactly 0.
            g_mean = jnp.float32(0.0)
            g_var = batch * jnp.sum(var_f / (var_f + BN_EPS)) / (n - 1)
        else:
            # batch == 1: BatchNorm skipped; mask padded columns out of stats.
            xn_ref[...] = x
            col = jax.lax.broadcasted_iota(jnp.int32, x.shape, 1)
            valid = col < hidden
            g_mean = jnp.sum(x) / n                          # pads are zero
            c = jnp.where(valid, x - g_mean, 0.0)
            g_var = jnp.sum(c * c) / (n - 1)
        g_std = jnp.sqrt(g_var)
        for j, coef in enumerate(QCOEFS):                    # 5 SMEM scalars
            q_ref[j] = coef * g_std + g_mean

    o_ref[...] = jnp.maximum(xn_ref[...] - q_ref[i], 0.0).astype(o_ref.dtype)


# --------------------------------------------------------------------------
# Two-pass path, pass 1: per-feature BN stats + per-tile partials for the
# global scalar statistic ("parallel" grid, no serial accumulator).
# --------------------------------------------------------------------------
def _stats_kernel(x_ref, feat_ref, part_ref, *, apply_bn, hidden, tile):
    x = x_ref[...].astype(jnp.float32)                       # (B, tH)
    if apply_bn:
        mean_f = jnp.mean(x, axis=0, keepdims=True)          # (1, tH)
        c = x - mean_f
        var_f = jnp.mean(c * c, axis=0, keepdims=True)
        feat_ref[0:1, :] = mean_f
        feat_ref[1:2, :] = jax.lax.rsqrt(var_f + BN_EPS)
        s0 = jnp.sum(var_f / (var_f + BN_EPS), keepdims=True)  # (1,1)
        s1 = jnp.zeros((1, 1), jnp.float32)
    else:
        # batch == 1: BN skipped -> identity per-feature transform; emit
        # per-tile shifted sums for a cancellation-free global variance.
        t = pl.program_id(0)
        feat_ref[0:1, :] = jnp.zeros((1, tile), jnp.float32)
        feat_ref[1:2, :] = jnp.ones((1, tile), jnp.float32)
        n_valid = jnp.minimum(tile, hidden - t * tile)
        col = jax.lax.broadcasted_iota(jnp.int32, x.shape, 1)
        valid = col < n_valid
        s = jnp.sum(x, keepdims=True)                        # pads are zero
        m_t = s / n_valid.astype(jnp.float32)
        c = jnp.where(valid, x - m_t, 0.0)
        s0 = s
        s1 = jnp.sum(c * c, keepdims=True)
    part_ref[0:1, :] = jnp.broadcast_to(s0, (1, LANES))
    part_ref[1:2, :] = jnp.broadcast_to(s1, (1, LANES))


# --------------------------------------------------------------------------
# Two-pass path, pass 2: lane-dense (B, tH) blocks of the (B, 5*H_pad) output.
# --------------------------------------------------------------------------
def _apply_kernel(x_ref, feat_ref, q_ref, o_ref):
    x = x_ref[...].astype(jnp.float32)
    xn = (x - feat_ref[0:1, :]) * feat_ref[1:2, :]
    q = q_ref[0, 0:1, 0:1]                                   # (1,1) quantile i
    o_ref[...] = jnp.maximum(xn - q, 0.0).astype(o_ref.dtype)


# --------------------------------------------------------------------------
# Wrapper.
# --------------------------------------------------------------------------
def brelu_forward(x: jax.Array, *, out_dtype=None,
                  max_block_bytes: int = DEFAULT_MAX_BLOCK_BYTES,
                  fuse_limit_bytes: int = DEFAULT_FUSE_LIMIT_BYTES) -> jax.Array:
    """x: (batch, hidden) -> (batch, hidden*5).  out_dtype=jnp.bfloat16 halves
    the dominant HBM write traffic (default keeps x.dtype, matching torch)."""
    B, H = x.shape
    apply_bn = B > 1              # static, same branch as the PyTorch module
    n = B * H                     # NOTE: n == 1 gives inf/nan, same as torch.var
    out_dtype = x.dtype if out_dtype is None else out_dtype

    H_pad = _round_up(H, LANES)   # pad only to 128 lanes, never to the tile
    if H_pad != H:
        x = jnp.pad(x, ((0, 0), (0, H_pad - H)))
    full_bytes = B * H_pad * 4

    if full_bytes <= fuse_limit_bytes:
        # ---- fused single-call path (x read from HBM exactly once) ----------
        vmem_limit = max(MIN_VMEM_LIMIT, min(MAX_VMEM_LIMIT, 6 * full_bytes))
        out = pl.pallas_call(
            functools.partial(_fused_kernel, apply_bn=apply_bn, batch=B, hidden=H),
            out_shape=jax.ShapeDtypeStruct((B, NQ * H_pad), out_dtype),
            grid_spec=pltpu.PrefetchScalarGridSpec(
                num_scalar_prefetch=0,
                grid=(NQ,),
                in_specs=[pl.BlockSpec((B, H_pad), lambda i: (0, 0))],
                out_specs=pl.BlockSpec((B, H_pad), lambda i: (0, i)),
                scratch_shapes=[pltpu.VMEM((B, H_pad), jnp.float32),
                                pltpu.SMEM((NQ,), jnp.float32)],
            ),
            compiler_params=pltpu.CompilerParams(
                dimension_semantics=("arbitrary",),
                vmem_limit_bytes=vmem_limit),
        )(x)
    else:
        # ---- two-pass path ---------------------------------------------------
        # TODO(synk): requires the full batch to fit in one (B, 128) block;
        #             a batch-tiled BN-stats pass is not implemented.
        tH = _pick_tile(B, H_pad, max_block_bytes)
        T = H_pad // tH
        block_bytes = B * tH * 4
        vmem_limit = max(MIN_VMEM_LIMIT, min(MAX_VMEM_LIMIT, 6 * block_bytes))

        # pass 1: per-feature (mean, rsqrt(var+eps)) + per-tile global partials
        feat, partials = pl.pallas_call(
            functools.partial(_stats_kernel, apply_bn=apply_bn, hidden=H, tile=tH),
            out_shape=(jax.ShapeDtypeStruct((2, H_pad), jnp.float32),
                       jax.ShapeDtypeStruct((T, 2, LANES), jnp.float32)),
            grid_spec=pltpu.PrefetchScalarGridSpec(
                num_scalar_prefetch=0,
                grid=(T,),
                in_specs=[pl.BlockSpec((B, tH), lambda t: (0, t))],
                out_specs=[pl.BlockSpec((2, tH), lambda t: (0, t)),
                           pl.BlockSpec((None, 2, LANES), lambda t: (t, 0, 0))],
            ),
            compiler_params=pltpu.CompilerParams(
                dimension_semantics=("parallel",),
                vmem_limit_bytes=vmem_limit),
        )(x)

        if apply_bn:
            g_mean = jnp.float32(0.0)                        # exact post-BN mean
            g_var = B * jnp.sum(partials[:, 0, 0]) / (n - 1)
        else:
            # batch == 1: combine per-tile shifted sums (no cancellation).
            s_t = partials[:, 0, 0]                          # (T,) tile sums
            css_t = partials[:, 1, 0]                        # (T,) centered SS
            n_t = jnp.asarray([min(tH, H - t * tH) for t in range(T)], jnp.float32)
            g_mean = jnp.sum(s_t) / n
            m_t = s_t / n_t
            g_var = (jnp.sum(css_t) + jnp.sum(n_t * (m_t - g_mean) ** 2)) / (n - 1)
        g_std = jnp.sqrt(g_var)
        quant = jnp.asarray(QCOEFS, jnp.float32) * g_std + g_mean        # (5,)
        quant_blk = jnp.broadcast_to(quant.reshape(NQ, 1, 1), (NQ, 8, LANES))

        # pass 2: normalize with pass-1 stats, 5 shifted ReLUs, dense stores.
        out = pl.pallas_call(
            _apply_kernel,
            out_shape=jax.ShapeDtypeStruct((B, NQ * H_pad), out_dtype),
            grid_spec=pltpu.PrefetchScalarGridSpec(
                num_scalar_prefetch=0,
                grid=(T, NQ),
                in_specs=[
                    pl.BlockSpec((B, tH), lambda t, i: (0, t)),           # x tile
                    pl.BlockSpec((2, tH), lambda t, i: (0, t)),           # feat stats
                    pl.BlockSpec((1, 8, LANES), lambda t, i: (i, 0, 0)),  # quantile
                ],
                out_specs=pl.BlockSpec((B, tH), lambda t, i: (0, i * T + t)),
            ),
            compiler_params=pltpu.CompilerParams(
                dimension_semantics=("parallel", "arbitrary"),
                vmem_limit_bytes=vmem_limit),
        )(x, feat, quant_blk)

    if H_pad != H:
        out = out.reshape(B, NQ, H_pad)[:, :, :H].reshape(B, NQ * H)
    return out


class BReLULayer:
    """JAX mirror of BReLU_Layer; biases / IncrementalBlock kept for fidelity
    but (as in the PyTorch forward) never used in the forward pass."""

    def __init__(self, hidden_size: int, key: jax.Array):
        self.hidden_size = hidden_size
        k_w, k_b = jax.random.split(key)
        gain = math.sqrt(2.0 / (1.0 + 5.0))          # kaiming_uniform_(a=sqrt(5))
        fan_in = hidden_size
        w_bound = gain * math.sqrt(3.0 / fan_in)
        self.weight = jax.random.uniform(
            k_w, (hidden_size, hidden_size), jnp.float32, -w_bound, w_bound)
        b_bound = 1.0 / math.sqrt(fan_in)
        self.biases = jax.random.uniform(
            k_b, (hidden_size,), jnp.float32, -b_bound, b_bound)
        self.inc_mean = jnp.zeros((hidden_size,), jnp.float32)
        self.inc_var = jnp.ones((hidden_size,), jnp.float32)

    def __call__(self, x: jax.Array) -> jax.Array:
        return brelu_forward(x)


def _reference(x: jnp.ndarray) -> jnp.ndarray:
    """Pure-JAX reference mirroring the PyTorch forward."""
    x = x.astype(jnp.float32)
    B, H = x.shape
    if B > 1:
        m = jnp.mean(x, axis=0, keepdims=True)
        v = jnp.mean((x - m) ** 2, axis=0, keepdims=True)
        x = (x - m) / jnp.sqrt(v + BN_EPS)
    g_mean = jnp.mean(x)
    g_var = jnp.sum((x - g_mean) ** 2) / (x.size - 1)
    g_std = jnp.sqrt(g_var)
    outs = [jnp.maximum(0.0, x - (c * g_std + g_mean)) for c in QCOEFS]
    return jnp.concatenate(outs, axis=1)


if __name__ == "__main__":
    key = jax.random.PRNGKey(0)
    k_layer, k1, k2, k3, k4, k5 = jax.random.split(key, 6)

    # Case 1: BN path, fused single-call kernel, H not a multiple of 128.
    x1 = jax.random.normal(k1, (8, 200), jnp.float32) * 3.0 + 1.5
    out1 = jax.block_until_ready(brelu_forward(x1))
    ref1 = _reference(x1)
    assert out1.shape == (8, 200 * NQ), out1.shape
    assert jnp.allclose(out1, ref1, atol=1e-4, rtol=1e-4), float(
        jnp.max(jnp.abs(out1 - ref1)))

    # Case 2: BN path, forced two-pass multi-tile path (tH=128, T=4).
    x2 = jax.random.normal(k2, (8, 512), jnp.float32)
    out2 = jax.block_until_ready(
        brelu_forward(x2, fuse_limit_bytes=0, max_block_bytes=8 * 128 * 4))
    ref2 = _reference(x2)
    assert out2.shape == (8, 512 * NQ), out2.shape
    assert jnp.allclose(out2, ref2, atol=1e-4, rtol=1e-4), float(
        jnp.max(jnp.abs(out2 - ref2)))

    # Case 2b: bf16 output (halves the dominant HBM write stream).
    out2b = jax.block_until_ready(brelu_forward(x2, out_dtype=jnp.bfloat16))
    assert out2b.dtype == jnp.bfloat16 and out2b.shape == (8, 512 * NQ)
    assert jnp.allclose(out2b.astype(jnp.float32), ref2, atol=5e-2, rtol=5e-2)

    # Case 3: batch == 1 (BatchNorm skipped), fused path, padded H.
    x3 = jax.random.normal(k3, (1, 160), jnp.float32) * 2.0 - 5.0
    out3 = jax.block_until_ready(brelu_forward(x3))
    ref3 = _reference(x3)
    assert out3.shape == (1, 160 * NQ), out3.shape
    assert jnp.allclose(out3, ref3, atol=1e-4, rtol=1e-4), float(
        jnp.max(jnp.abs(out3 - ref3)))

    # Case 4: batch == 1, forced two-pass path (stable tile-combined variance),
    # non-zero mean and a padded last tile.
    x4 = jax.random.normal(k4, (1, 300), jnp.float32) + 10.0
    out4 = jax.block_until_ready(
        brelu_forward(x4, fuse_limit_bytes=0, max_block_bytes=1 * 128 * 4))
    ref4 = _reference(x4)
    assert out4.shape == (1, 300 * NQ), out4.shape
    assert jnp.allclose(out4, ref4, atol=1e-4, rtol=1e-4), float(
        jnp.max(jnp.abs(out4 - ref4)))

    # Case 5: the layer wrapper (hidden=32).
    layer = BReLULayer(32, k_layer)
    x5 = jax.random.normal(k5, (8, 32), jnp.float32)
    out5 = jax.block_until_ready(layer(x5))
    ref5 = _reference(x5)
    assert out5.shape == (8, 32 * NQ), out5.shape
    assert jnp.allclose(out5, ref5, atol=1e-4, rtol=1e-4), float(
        jnp.max(jnp.abs(out5 - ref5)))

    print("KERNEL_OK")
</pallas_src>

<mosaic_0001>
module attributes {stable_mosaic.version = 11 : i64} {
  func.func @_fused_kernel(%arg0: i32, %arg1: memref<8x256xf32, #tpu.memory_space<vmem>>, %arg2: memref<8x256xf32, #tpu.memory_space<vmem>>, %arg3: memref<8x256xf32, #tpu.memory_space<vmem>>, %arg4: memref<5xf32, #tpu.memory_space<smem>>) attributes {dimension_semantics = [#tpu.dimension_semantics<arbitrary>], iteration_bounds = array<i64: 5>, scalar_prefetch = 0 : i64, scratch_operands = 2 : i64, tpu.core_type = #tpu.core_type<tc>, window_params = [{pipeline_mode = #tpu.pipeline_mode<synchronous>, transform_indices = @transform_0, window_bounds = array<i64: 8, 256>}, {transform_indices = @transform_1, window_bounds = array<i64: 8, 256>}]} {
    %c0_i32 = arith.constant 0 : i32
    %0 = arith.cmpi eq, %arg0, %c0_i32 : i32
    %1 = arith.extui %0 : i1 to i32
    %c0_i32_0 = arith.constant 0 : i32
    %2 = arith.cmpi ne, %1, %c0_i32_0 : i32
    scf.if %2 {
      %c0_4 = arith.constant 0 : index
      %c0_5 = arith.constant 0 : index
      %11 = vector.load %arg1[%c0_4, %c0_5] : memref<8x256xf32, #tpu.memory_space<vmem>>, vector<8x256xf32>
      %cst_6 = arith.constant dense<0.000000e+00> : vector<256xf32>
      %12 = vector.multi_reduction <add>, %11, %cst_6 [0] : vector<8x256xf32> to vector<256xf32>
      %13 = vector.shape_cast %12 : vector<256xf32> to vector<1x256xf32>
      %cst_7 = arith.constant 8.000000e+00 : f32
      %14 = vector.broadcast %cst_7 : f32 to vector<1x256xf32>
      %15 = arith.divf %13, %14 : vector<1x256xf32>
      %16 = vector.broadcast %15 : vector<1x256xf32> to vector<8x256xf32>
      %17 = arith.subf %11, %16 : vector<8x256xf32>
      %18 = arith.mulf %17, %17 : vector<8x256xf32>
      %cst_8 = arith.constant dense<0.000000e+00> : vector<256xf32>
      %19 = vector.multi_reduction <add>, %18, %cst_8 [0] : vector<8x256xf32> to vector<256xf32>
      %20 = vector.shape_cast %19 : vector<256xf32> to vector<1x256xf32>
      %cst_9 = arith.constant 8.000000e+00 : f32
      %21 = vector.broadcast %cst_9 : f32 to vector<1x256xf32>
      %22 = arith.divf %20, %21 : vector<1x256xf32>
      %cst_10 = arith.constant 9.99999974E-6 : f32
      %23 = vector.broadcast %cst_10 : f32 to vector<1x256xf32>
      %24 = arith.addf %22, %23 : vector<1x256xf32>
      %25 = math.rsqrt %24 : vector<1x256xf32>
      %26 = vector.broadcast %25 : vector<1x256xf32> to vector<8x256xf32>
      %27 = arith.mulf %17, %26 : vector<8x256xf32>
      %c0_11 = arith.constant 0 : index
      %c0_12 = arith.constant 0 : index
      %28 = vector.load %arg3[%c0_11, %c0_12] : memref<8x256xf32, #tpu.memory_space<vmem>>, vector<8x256xf32>
      tpu.vector_store %arg3[%c0_11, %c0_12], %27 {strides = array<i32>} : memref<8x256xf32, #tpu.memory_space<vmem>>, vector<8x256xf32>,
      %cst_13 = arith.constant 9.99999974E-6 : f32
      %29 = vector.broadcast %cst_13 : f32 to vector<1x256xf32>
      %30 = arith.addf %22, %29 : vector<1x256xf32>
      %31 = arith.divf %22, %30 : vector<1x256xf32>
      %32 = vector.shape_cast %31 : vector<1x256xf32> to vector<1x1x256xf32>
      %cst_14 = arith.constant dense<0.000000e+00> : vector<1xf32>
      %33 = vector.multi_reduction <add>, %32, %cst_14 [1, 2] : vector<1x1x256xf32> to vector<1xf32>
      %34 = vector.shape_cast %33 : vector<1xf32> to vector<1x1x1xf32>
      %35 = vector.extract %34[0, 0, 0] : f32 from vector<1x1x1xf32>
      %cst_15 = arith.constant 8.000000e+00 : f32
      %36 = arith.mulf %cst_15, %35 : f32
      %cst_16 = arith.constant 1.599000e+03 : f32
      %37 = arith.divf %36, %cst_16 : f32
      %38 = math.sqrt %37 : f32
      %cst_17 = arith.constant -2.020000e+00 : f32
      %39 = arith.mulf %cst_17, %38 : f32
      %cst_18 = arith.constant 0.000000e+00 : f32
      %40 = arith.addf %39, %cst_18 : f32
      %c0_19 = arith.constant 0 : index
      %41 = memref.load %arg4[%c0_19] : memref<5xf32, #tpu.memory_space<smem>>
      memref.store %40, %arg4[%c0_19] : memref<5xf32, #tpu.memory_space<smem>>
      %cst_20 = arith.constant -0.764999985 : f32
      %42 = arith.mulf %cst_20, %38 : f32
      %cst_21 = arith.constant 0.000000e+00 : f32
      %43 = arith.addf %42, %cst_21 : f32
      %c1 = arith.constant 1 : index
      %44 = memref.load %arg4[%c1] : memref<5xf32, #tpu.memory_space<smem>>
      memref.store %43, %arg4[%c1] : memref<5xf32, #tpu.memory_space<smem>>
      %cst_22 = arith.constant -1.950000e-01 : f32
      %45 = arith.mulf %cst_22, %38 : f32
      %cst_23 = arith.constant 0.000000e+00 : f32
      %46 = arith.addf %45, %cst_23 : f32
      %c2 = arith.constant 2 : index
      %47 = memref.load %arg4[%c2] : memref<5xf32, #tpu.memory_space<smem>>
      memref.store %46, %arg4[%c2] : memref<5xf32, #tpu.memory_space<smem>>
      %cst_24 = arith.constant 3.150000e-01 : f32
      %48 = arith.mulf %cst_24, %38 : f32
      %cst_25 = arith.constant 0.000000e+00 : f32
      %49 = arith.addf %48, %cst_25 : f32
      %c3 = arith.constant 3 : index
      %50 = memref.load %arg4[%c3] : memref<5xf32, #tpu.memory_space<smem>>
      memref.store %49, %arg4[%c3] : memref<5xf32, #tpu.memory_space<smem>>
      %cst_26 = arith.constant 9.300000e-01 : f32
      %51 = arith.mulf %cst_26, %38 : f32
      %cst_27 = arith.constant 0.000000e+00 : f32
      %52 = arith.addf %51, %cst_27 : f32
      %c4 = arith.constant 4 : index
      %53 = memref.load %arg4[%c4] : memref<5xf32, #tpu.memory_space<smem>>
      memref.store %52, %arg4[%c4] : memref<5xf32, #tpu.memory_space<smem>>
    } else {
    }
    %c0 = arith.constant 0 : index
    %c0_1 = arith.constant 0 : index
    %3 = vector.load %arg3[%c0, %c0_1] : memref<8x256xf32, #tpu.memory_space<vmem>>, vector<8x256xf32>
    %4 = arith.index_cast %arg0 : i32 to index
    %5 = memref.load %arg4[%4] : memref<5xf32, #tpu.memory_space<smem>>
    %6 = vector.broadcast %5 : f32 to vector<8x256xf32>
    %7 = arith.subf %3, %6 : vector<8x256xf32>
    %cst = arith.constant 0.000000e+00 : f32
    %8 = vector.broadcast %cst : f32 to vector<8x256xf32>
    %9 = arith.maximumf %7, %8 : vector<8x256xf32>
    %c0_2 = arith.constant 0 : index
    %c0_3 = arith.constant 0 : index
    %10 = vector.load %arg2[%c0_2, %c0_3] : memref<8x256xf32, #tpu.memory_space<vmem>>, vector<8x256xf32>
    tpu.vector_store %arg2[%c0_2, %c0_3], %9 {strides = array<i32>} : memref<8x256xf32, #tpu.memory_space<vmem>>, vector<8x256xf32>,
    return
  }
  func.func @transform_0(%arg0: i32) -> (i32, i32) {
    %c0_i32 = arith.constant 0 : i32
    %c0_i32_0 = arith.constant 0 : i32
    %c0_i32_1 = arith.constant 0 : i32
    return %c0_i32, %c0_i32_0 : i32, i32
  }
  func.func @transform_1(%arg0: i32) -> (i32, i32) {
    %c0_i32 = arith.constant 0 : i32
    %c0_i32_0 = arith.constant 0 : i32
    return %c0_i32, %arg0 : i32, i32
  }
}

</mosaic_0001>

<bundles_post_ra>
// kernel: tpu_custom_call.1
= control target key start
LH: loop header
LB: loop body
LE: loop exit
PB: predicated region body
PF: predicated region fallthrough
CT: control target
= control target key end

     0   :  { %6 = vsyncpa [#allocation5], 0  ;;  %s590_s0 = inlined_call_operand.hbm [shape: f32[8,256], index: 0, kind: input, shape index: {}]   ;;  %s591_s1 = inlined_call_operand.hbm [shape: f32[8,1280], index: 1, kind: output, shape index: {}]  }
   0x1   :  { %7 = vsyncpa [#allocation6], 0 }
   0x2   :  { %9 = vsyncpa [#allocation6 + $0x1], 0  ;;  %s471_s6 = smov 0   ;;  %s473_s7 = smov 0  }
   0x3   :  { %s475_s8 = smov 0   ;;  %s477_s9 = smov 0  }
   0x4 LB: > { %s492_s10 = sadd.s32 4294967295, %s457_s9   ;;  %s290_s11 = sadd.s32 4294967294, %s457_s9   ;;  %s457_s9 = sphi %s477_s9, %s600_s9   ;;  %s453_s8 = sphi %s475_s8, %s599_s8   ;;  %s449_s7 = sphi %s473_s7, %s598_s7   ;;  %s445_s6 = sphi %s471_s6, %s597_s6  }
   0x5   : > { %s496_s12 = sadd.s32 1, %s457_s9   ;;  %s43_s13 = sadd.s32 1, %s453_s8 }
   0x6   : > { %s40_s14 = ssub.s32 %s457_s9, %s496_s12  ;;  %p53_p0 = scmp.ne.s32.totalorder %s453_s8, %s449_s7 }
   0x7   : > { %p41_p1 = scmp.eq.s32.totalorder %s40_s14, 0  ;;  %p54_p2 = scmp.eq.s32.totalorder %s492_s10, 4 }
   0x8   : > { %p59_p3 = scmp.ne.s32.totalorder %s449_s7, %s445_s6  ;;  %p60_p4 = scmp.eq.s32.totalorder %s290_s11, 4 }
   0x9   : > { %s507_s15 = scalar_select %p41_p1, %s453_s8, %s43_s13  }
   0xa   : > { %p509_p5 = por %p54_p2, %p53_p0  ;;  %p513_p6 = por %p60_p4, %p59_p3 }
   0xb   : > { %p291_p7 = scmp.ge.s32.totalorder %s457_s9, 1  ;;  %p67_p8 = scmp.lt.s32.totalorder %s457_s9, 6 }
   0xc   : > { %s593_s17 = scalar_select %p513_p6, 1, 0 }
   0xd   : > { %p321_p10 = scmp.eq.s32.totalorder %s492_s10, 0  ;;  %p521_p11 = pnand %p291_p7, %p67_p8 }
   0xe   : > { %s459_s19 = smov [#allocation4]  }
   0xf   : > { %s80_s20 = sshll.u32 %s459_s19, 4  ;;  %p313_p12 = pneg %p521_p11  ;;  %s81_s20 = int_to_ptr.vmem [resolvable:$true] %s80_s20 }
  0x10   : > { %s378_s21 = scalar_lea.vmem %s81_s20, 256  ;;  %p386_p4 = scmp.lt.s32.totalorder %s81_s20, %s81_s20 }
  0x11   : > { %p314_p13 = pnand %p321_p10, %p313_p12  ;;  %p379_p1 = scmp.ne.s32.totalorder %s81_s20, %s378_s21 }
  0x12   : > { %p387_p9 = scmp.lt.s32.totalorder %s378_s21, %s378_s21 }
  0x13   : > { %p369_p0 = pneg %p314_p13 }
  0x14   : > { %p388_p6 = por %p387_p9, %p386_p4 }
  0x15   : > { %p381_p2 = pnand %p379_p1, %p369_p0 }
  0x17   : > { %p382_p3 = pneg %p381_p2 }
  0x19   : > { %p389_p7 = pnand %p388_p6, %p382_p3 }
  0x1b   : > { %392 = shalt.err (!%p389_p7)
}
  0x1c   : > { %316 = dma.hbm_to_vmem [thread:$0]  (!%p314_p13), %s590_s0, 256, %s81_s20, [#allocation5]  }
  0x1d   : > { %93 = sbr.rel (%p521_p11) target bundleno = 403 (0x193), region = 24 }
  0x22   : > { %436 = dma.done.wait (%p321_p10), [#allocation5], 256  }
  0x23   : > { %438 = vsyncadd (%p321_p10), [#allocation5], 4294967040  ;;  %s105_s24 = sand.u32 1, %s449_s7   ;;  %p595_p6 = scmp.ne.s32.totalorder %s492_s10, 0 }
  0x24   : > { %s295_s25 = sshll.u32 %s105_s24, 4 }
  0x25   : > { %s541_s26 = scalar_lea.vmem [#allocation7], %s295_s25  ;;  %112 = sbr.rel (%p595_p6) target bundleno = 379 (0x17b), region = 32 }
  0x2a   : > { %v113_v0 = vld [vmem:[#allocation4] sm:$0xff]  ;;  %v114_v1 = vld [vmem:[#allocation4 + $0x8] sm:$0xff]  ;;  %vm160_vm0 = vcmask 1040384  }
  0x2b   : > { %v115_v2 = vrot.slane %v113_v0, 4  ;;  %v121_v3 = vrot.slane %v114_v1, 4 }
  0x2d   : > { %v116_v4 = vadd.f32 %v115_v2, %v113_v0  ;;  %v122_v5 = vadd.f32 %v121_v3, %v114_v1 }
  0x2f   : > { %v117_v6 = vrot.slane %v116_v4, 2  ;;  %v123_v7 = vrot.slane %v122_v5, 2 }
  0x31   : > { %v118_v8 = vadd.f32 %v117_v6, %v116_v4  ;;  %v124_v9 = vadd.f32 %v123_v7, %v122_v5 }
  0x33   : > { %v119_v10 = vrot.slane %v118_v8, 1  ;;  %v125_v11 = vrot.slane %v124_v9, 1 }
  0x35   : > { %v120_v12 = vadd.f32 %v119_v10, %v118_v8  ;;  %v126_v13 = vadd.f32 %v125_v11, %v124_v9 }
  0x37   : > { %v128_v14 = vmul.f32 0.125, %v120_v12  ;;  %v129_v15 = vmul.f32 0.125, %v126_v13 }
  0x39   : > { %v130_v16 = vsub.f32 %v113_v0, %v128_v14  ;;  %v131_v17 = vsub.f32 %v114_v1, %v129_v15 }
  0x3b   : > { %v132_v18 = vmul.f32 %v130_v16, %v130_v16  ;;  %v133_v19 = vmul.f32 %v131_v17, %v131_v17 }
  0x3d   : > { %v134_v20 = vrot.slane %v132_v18, 4  ;;  %v140_v21 = vrot.slane %v133_v19, 4 }
  0x3f   : > { %v135_v22 = vadd.f32 %v134_v20, %v132_v18  ;;  %v141_v23 = vadd.f32 %v140_v21, %v133_v19 }
  0x41   : > { %v136_v24 = vrot.slane %v135_v22, 2  ;;  %v142_v25 = vrot.slane %v141_v23, 2 }
  0x43   : > { %v137_v26 = vadd.f32 %v136_v24, %v135_v22  ;;  %v143_v27 = vadd.f32 %v142_v25, %v141_v23 }
  0x45   : > { %v138_v28 = vrot.slane %v137_v26, 1  ;;  %v144_v29 = vrot.slane %v143_v27, 1 }
  0x47   : > { %v139_v30 = vadd.f32 %v138_v28, %v137_v26  ;;  %v145_v31 = vadd.f32 %v144_v29, %v143_v27 }
  0x49   : > { %v146_v32 = vmul.f32 0.125, %v139_v30  ;;  %v147_v33 = vmul.f32 0.125, %v145_v31 }
  0x4b   : > { %v148_v34 = vadd.f32 1e-05, %v146_v32  ;;  %v149_v35 = vadd.f32 1e-05, %v147_v33 }
  0x4d   : > { %357 = vrsqrt.f32 %v148_v34 }
  0x4e   : > { %359 = vrsqrt.f32 %v149_v35 }
  0x4f   : > { %361 = vrcp.f32 %v148_v34 }
  0x50   : > { %363 = vrcp.f32 %v149_v35 }
  0x5a   : > { %v358_v36 = vpop.eup %357 }
  0x5b   : > { %v360_v37 = vpop.eup %359  ;;  %v152_v38 = vmul.f32 %v358_v36, %v130_v16 }
  0x5c   : > { %v362_v39 = vpop.eup %361  ;;  %v153_v40 = vmul.f32 %v360_v37, %v131_v17 }
  0x5d   : > { %v364_v41 = vpop.eup %363  ;;  %154 = vst [vmem:[#allocation2] sm:$0xff] %v152_v38  ;;  %v157_v42 = vmul.f32 %v362_v39, %v146_v32 }
  0x5e   : > { %155 = vst [vmem:[#allocation2 + $0x8] sm:$0xff] %v153_v40  ;;  %v159_v43 = vmul.f32 %v364_v41, %v147_v33 }
  0x5f   : > { %v161_v44 = vsel %vm160_vm0, %v157_v42, 0.0 }
  0x60   : > { %v162_v45 = vsel %vm160_vm0, %v159_v43, 0.0 }
  0x61   : > { %v163_v46 = vadd.f32 %v162_v45, %v161_v44 }
  0x63   : > { %164 = vadd.xlane.f32.xlu0 %v163_v46 }
  0xec   : > { %v165_v47 = vpop.xlane.xlu0 %164 }
  0xed   : > { %v166_v48 = vrot.slane %v165_v47, 4 }
  0xef   : > { %v167_v49 = vadd.f32 %v166_v48, %v165_v47 }
  0xf1   : > { %v168_v50 = vrot.slane %v167_v49, 2 }
  0xf3   : > { %v169_v51 = vadd.f32 %v168_v50, %v167_v49 }
  0xf5   : > { %v170_v52 = vrot.slane %v169_v51, 1 }
  0xf7   : > { %v171_v53 = vadd.f32 %v170_v52, %v169_v51 }
  0xf9   : > { %303 = vpush %v171_v53 }
 0x12a   : > { %s304_s27 = spop %303 }
 0x12b   : > { %s173_s28 = smul.f32 8.0, %s304_s27 }
 0x12d   : > { %s176_s29 = smul.f32 0.00062539085, %s173_s28 }
 0x12f   : > { %v177_v54 = vstv %s176_s29 }
 0x130   : > { %365 = vrsqrt.f32 %v177_v54  ;;  %vm180_vm1 = vcmp.eq.f32.partialorder %v177_v54, inf  ;;  %v183_v57 = vand.u32 2147483648, %v177_v54  ;;  %vm182_vm2 = vcmp.eq.f32.partialorder %v177_v54, 0.0 }
 0x13d   : > { %v366_v55 = vpop.eup %365 }
 0x13e   : > { %v179_v56 = vmul.f32 %v366_v55, %v177_v54 }
 0x140   : > { %v181_v58 = vsel %vm180_vm1, %v177_v54, %v179_v56 }
 0x141   : > { %v184_v59 = vsel %vm182_vm2, %v183_v57, %v181_v58 }
 0x142   : > { %305 = vpush %v184_v59 }
 0x173   : > { %s306_s30 = spop %305 }
 0x174   : > { %s186_s2 = smul.f32 -2.02, %s306_s30 }
 0x175   : > { %s190_s3 = smul.f32 -0.765, %s306_s30 }
 0x176   : > { %189 = sst [smem:[#allocation3]] %s186_s2  ;;  %s194_s4 = smul.f32 -0.195, %s306_s30 }
 0x177   : > { %193 = sst [smem:[#allocation3 + $0x1]] %s190_s3  ;;  %s198_s5 = smul.f32 0.315, %s306_s30 }
 0x178   : > { %197 = sst [smem:[#allocation3 + $0x2]] %s194_s4  ;;  %s202_s11 = smul.f32 0.93, %s306_s30 }
 0x179   : > { %201 = sst [smem:[#allocation3 + $0x3]] %s198_s5 }
 0x17a   : > { %205 = sst [smem:[#allocation3 + $0x4]] %s202_s11 }
 0x17b PF: > { %s208_s13 = sld [smem:[#allocation3 + %s492_s10]]  ;;  %v206_v60 = vld [vmem:[#allocation2] sm:$0xff]  ;;  %v207_v61 = vld [vmem:[#allocation2 + $0x8] sm:$0xff]  ;;  %s302_s14 = sshll.u32 %s492_s10, 8 }
 0x17c   : > { %s231_s18 = sshll.u32 %s541_s26, 4  ;;  %s551_s21 = scalar_lea.hbm %s591_s1, %s302_s14  ;;  %s232_s18 = int_to_ptr.vmem [resolvable:$true] %s231_s18 }
 0x17d   : > { %s217_s22 = scalar_lea.sflag [#allocation6], %s105_s24  ;;  %s393_s23 = scalar_lea.vmem %s232_s18, 256 }
 0x17e   : > { %p394_p8 = scmp.ne.s32.totalorder %s232_s18, %s393_s23  ;;  %s460_s10 = smov [#allocation7]  }
 0x17f   : > { %s397_s25 = sshll.u32 %s460_s10, 4  ;;  %s398_s25 = int_to_ptr.vmem [resolvable:$false] %s397_s25 }
 0x180   : > { %p395_p9 = pnand %p394_p8, %p509_p5  ;;  %s399_s27 = scalar_lea.vmem %s398_s25, 512 }
 0x181   : > { %v209_v62 = vstv %s208_s13  ;;  %p400_p11 = scmp.lt.s32.totalorder %s232_s18, %s398_s25  ;;  %p401_p12 = scmp.lt.s32.totalorder %s399_s27, %s393_s23 }
 0x182   : > { %v210_v63 = vsub.f32 %v206_v60, %v209_v62  ;;  %v211_v0 = vsub.f32 %v207_v61, %v209_v62  ;;  %p396_p10 = pneg %p395_p9 }
 0x183   : > { %p402_p13 = por %p401_p12, %p400_p11 }
 0x184   : > { %v212_v1 = vmax.f32 %v210_v63, 0.0  ;;  %v213_v2 = vmax.f32 %v211_v0, 0.0 }
 0x185   : > { %p403_p0 = pnand %p402_p13, %p396_p10 }
 0x186   : > { %214 = vst [vmem:[%s541_s26] sm:$0xff] %v212_v1  ;;  %215 = vst [vmem:[%s541_s26 + $0x8] sm:$0xff] %v213_v2 }
 0x187   : > { %406 = shalt.err (!%p403_p0)
}
 0x188   : > { %s407_s26 = scalar_lea.hbm %s551_s21, 256  ;;  %s411_s29 = scalar_lea.hbm %s591_s1, 1280 }
 0x189   : > { %p408_p1 = scmp.ne.s32.totalorder %s551_s21, %s407_s26  ;;  %p412_p4 = scmp.lt.s32.totalorder %s551_s21, %s591_s1 }
 0x18a   : > { %p413_p7 = scmp.lt.s32.totalorder %s411_s29, %s407_s26 }
 0x18b   : > { %p409_p2 = pnand %p408_p1, %p509_p5 }
 0x18c   : > { %p414_p6 = por %p413_p7, %p412_p4 }
 0x18d   : > { %p410_p3 = pneg %p409_p2 }
 0x18f   : > { %p415_p8 = pnand %p414_p6, %p410_p3 }
 0x191   : > { %418 = shalt.err (!%p415_p8)
}
 0x192   : > { %311 = dma.vmem_to_hbm [thread:$0]  (%p509_p5), %s232_s18, 256, %s551_s21, %s217_s22  }
 0x193 PF: > { %p323_p9 = scmp.ge.s32.totalorder %s457_s9, 2  ;;  %s243_s3 = sand.u32 1, %s445_s6  }
 0x194   : > { %p596_p10 = scmp.ne.s32.totalorder %s593_s17, 0  ;;  %s244_s4 = scalar_lea.sflag [#allocation6], %s243_s3 }
 0x196   : > { %p318_p11 = pnand %p323_p9, %p596_p10 }
 0x198   : > { %p319_p12 = pneg %p318_p11 }
 0x19a   : > { %440 = dma.done.wait (%p319_p12), %s244_s4, 256  }
 0x19b   : > { %442 = vsyncadd (%p319_p12), %s244_s4, 4294967040  ;;  %p12_p13 = scmp.ge.s32.totalorder %s496_s12, 7   ;;  %s597_s6 = smov %s449_s7 }
 0x19c   : > { %s598_s7 = smov %s453_s8  ;;  %s599_s8 = smov %s507_s15 }
 0x19d   : > { %s600_s9 = smov %s496_s12  ;;  %14 = sbr.rel (!%p12_p13) target bundleno = 4 (0x4), region = 70 }
 0x1a2   :  { %249 = vsyncpa [#allocation5], 1 }
 0x1a3   :  { %251 = vsyncpa [#allocation5 + $0x1], 1 }
 0x1a4   :  { %252 = vsyncpa [#allocation6], 1 }
 0x1a5   :  { %254 = vsyncpa [#allocation6 + $0x1], 1 }

</bundles_post_ra>
